<compile_context>
chip_gen: v6e
topology: v6e:2x2x1
jax: 0.10.0
libtpu: 0.0.40
codegen_flags: <defaults>
</compile_context>

<pallas_src>
import numpy as np
import jax
import jax.numpy as jnp
from jax.experimental import pallas as pl
from jax.experimental.pallas import tpu as pltpu

INPUT_DIM = 9
EMBED_DIM = 9
HEAD_DIM = 4
DIM_FF = 2048
PRED_WINDOW = 1
LN_EPS = 1e-5

# bf16 elementwise (GELU) is only a win where the VALU/EUP are bf16-capable
# (v6e / v7x).  On v5e and older keep the f32 elementwise fast path; MXU
# operands are bf16 on every generation.
try:
    _DEV_KIND = jax.devices()[0].device_kind.lower()
except Exception:  # pragma: no cover
    _DEV_KIND = ""
GELU_BF16 = not any(v in _DEV_KIND for v in ("v2", "v3", "v4", "v5"))

# ---- f32 small-parameter slab layout: (P_ROWS, P_COLS) -----------------------
# rows 0:9     fused projection weights [Wz | Wq' | Wk' | Wv'] (128-aligned cols)
# row  9       fused projection bias    [bz | bq' | bk' | bv']
# rows 10..15  bo, g1, be1, b2, g2, be2                      (cols 0:9)
# rows 16:25   wh1 (9,4)                                     (cols 0:4)
# row  25      bh1                                           (cols 0:4)
# rows 32:36   wh2 (4,4)                                     (cols 0:4)
# row  36      bh2                                           (cols 0:4)
# rows 37:37+PW   wh3^T (PW,4)                               (cols 0:4)
# rows 37+PW:..   bh3 stored as a COLUMN (PW,1)              (col 0)
P_COLS = 512
C_Z, C_Q, C_K, C_V = 0, 128, 256, 384
R_FW, R_FB = 0, 9
R_BO, R_G1, R_BE1, R_B2, R_G2, R_BE2 = 10, 11, 12, 13, 14, 15
R_WH1, R_BH1 = 16, 25
R_WH2, R_BH2 = 32, 36
R_WH3 = 37
R_BH3 = R_WH3 + PRED_WINDOW
P_ROWS = 40

# ---- bf16 feed-forward slab layout: (FF_ROWS, DIM_FF) ------------------------
RF_W1 = 0     # rows 0:9    w1   (9, 2048)
RF_W2T = 16   # rows 16:25  w2^T (9, 2048)   (rhs-last-dim contraction in-kernel)
RF_B1 = 32    # row 32      b1   (1, 2048)   (already bf16-rounded -> exact)
FF_ROWS = 48


def _layernorm(z, gamma, beta):
    mean = jnp.mean(z, axis=-1, keepdims=True)
    var = jnp.mean(jnp.square(z - mean), axis=-1, keepdims=True)
    return (z - mean) * jax.lax.rsqrt(var + LN_EPS) * gamma + beta


def _gelu_exact(x):
    # Python-float (weak) constants so this stays in the dtype of `x`
    # (bf16 on v6e/v7x, f32 on v5e and older).
    return 0.5 * x * (1.0 + jax.lax.erf(x * 0.7071067811865476))


def transformer_kernel(x_ref, p_ref, ff_ref, out_ref):
    f32, bf16 = jnp.float32, jnp.bfloat16
    E, H, PW = EMBED_DIM, HEAD_DIM, PRED_WINDOW

    x = x_ref[...]                                          # (B, 9) f32

    # ---- fused x -> [z | q*scale | k | v@Wo] in a single MXU dot --------------
    zqkv = (jnp.dot(x, p_ref[R_FW:R_FW + E, :], preferred_element_type=f32)
            + p_ref[R_FB:R_FB + 1, :])                      # (B, 512)
    z = zqkv[:, C_Z:C_Z + E]
    q = zqkv[:, C_Q:C_Q + E]                                # 1/sqrt(E) pre-folded
    k = zqkv[:, C_K:C_K + E]
    v = zqkv[:, C_V:C_V + E]                                # out_proj pre-folded

    # ---- single-head self-attention over the row axis (seq_len == batch) ------
    # q @ k^T without an explicit transpose: contract the last dims of both.
    s = jax.lax.dot_general(q, k, (((1,), (1,)), ((), ())),
                            preferred_element_type=f32)
    s = s - jnp.max(s, axis=-1, keepdims=True)
    e = jnp.exp(s)
    p_attn = e * pl.reciprocal(jnp.sum(e, axis=-1, keepdims=True), approx=True)
    # out_proj weight is folded into v (softmax rows sum to 1); only bo remains.
    attn = (jnp.dot(p_attn, v, preferred_element_type=f32)
            + p_ref[R_BO:R_BO + 1, 0:E])

    # ---- add & norm 1 ----------------------------------------------------------
    z = _layernorm(z + attn, p_ref[R_G1:R_G1 + 1, 0:E], p_ref[R_BE1:R_BE1 + 1, 0:E])

    # ---- feed-forward: bf16 weights on the MXU, f32 accumulation ---------------
    h = (jnp.dot(z.astype(bf16), ff_ref[RF_W1:RF_W1 + E, :],
                 preferred_element_type=f32)
         + ff_ref[RF_B1:RF_B1 + 1, :])                      # bf16 bias promotes
    if GELU_BF16:            # v6e/v7x: bf16 VALU/EUP -> ~2x elementwise, 1/2 vregs
        h = _gelu_exact(h.astype(bf16))
    else:                    # v5e and older: f32 is the elementwise fast path
        h = _gelu_exact(h).astype(bf16)
    # w2 is stored transposed in the slab -> rhs-last-dim contraction, no .T.
    h = (jax.lax.dot_general(h, ff_ref[RF_W2T:RF_W2T + E, :],
                             (((1,), (1,)), ((), ())),
                             preferred_element_type=f32)
         + p_ref[R_B2:R_B2 + 1, 0:E])
    z = _layernorm(z + h, p_ref[R_G2:R_G2 + 1, 0:E], p_ref[R_BE2:R_BE2 + 1, 0:E])

    # ---- rul head: Linear-ReLU-Linear-ReLU-Linear -------------------------------
    h = jnp.maximum(
        jnp.dot(z, p_ref[R_WH1:R_WH1 + E, 0:H], preferred_element_type=f32)
        + p_ref[R_BH1:R_BH1 + 1, 0:H], 0.0)
    h = jnp.maximum(
        jnp.dot(h, p_ref[R_WH2:R_WH2 + H, 0:H], preferred_element_type=f32)
        + p_ref[R_BH2:R_BH2 + 1, 0:H], 0.0)
    # final linear emitted lane-dense as (PW, B); wh3 stored transposed, so this
    # is again an rhs-last-dim contraction.  Bias is a (PW, 1) column.
    out = jax.lax.dot_general(p_ref[R_WH3:R_WH3 + PW, 0:H], h,
                              (((1,), (1,)), ((), ())),
                              preferred_element_type=f32)
    out_ref[...] = out + p_ref[R_BH3:R_BH3 + PW, 0:1]


def init_params(key):
    """PyTorch-style random parameters.  Weights stored (in, out) so the kernel
    computes x @ W + b.  w1/b1/w2/b2 are pre-rounded to bf16-representable f32
    (they are shipped to the kernel as bf16)."""
    ks = jax.random.split(key, 12)

    def lin(kw, fan_in, fan_out, round_bf16=False):
        bound = 1.0 / np.sqrt(fan_in)
        w = jax.random.uniform(kw, (fan_in, fan_out), jnp.float32, -bound, bound)
        b = jax.random.uniform(jax.random.fold_in(kw, 1), (1, fan_out),
                               jnp.float32, -bound, bound)
        if round_bf16:
            w = w.astype(jnp.bfloat16).astype(jnp.float32)
            b = b.astype(jnp.bfloat16).astype(jnp.float32)
        return w, b

    p = {}
    p["pos"] = jax.random.normal(ks[0], (1, EMBED_DIM), jnp.float32)
    p["wp"], p["bp"] = lin(ks[1], INPUT_DIM, EMBED_DIM)
    p["wq"], p["bq"] = lin(ks[2], EMBED_DIM, EMBED_DIM)
    p["wk"], p["bk"] = lin(ks[3], EMBED_DIM, EMBED_DIM)
    p["wv"], p["bv"] = lin(ks[4], EMBED_DIM, EMBED_DIM)
    p["wo"], p["bo"] = lin(ks[5], EMBED_DIM, EMBED_DIM)
    p["g1"] = jnp.ones((1, EMBED_DIM), jnp.float32)
    p["be1"] = jnp.zeros((1, EMBED_DIM), jnp.float32)
    p["w1"], p["b1"] = lin(ks[6], EMBED_DIM, DIM_FF, round_bf16=True)
    p["w2"], p["b2"] = lin(ks[7], DIM_FF, EMBED_DIM, round_bf16=True)
    p["g2"] = jnp.ones((1, EMBED_DIM), jnp.float32)
    p["be2"] = jnp.zeros((1, EMBED_DIM), jnp.float32)
    p["wh1"], p["bh1"] = lin(ks[8], EMBED_DIM, HEAD_DIM)
    p["wh2"], p["bh2"] = lin(ks[9], HEAD_DIM, HEAD_DIM)
    p["wh3"], p["bh3"] = lin(ks[10], HEAD_DIM, PRED_WINDOW)
    return p


def pack_params(p):
    """Fold weights and pack into: one f32 (40, 512) slab + one bf16 (48, 2048)
    feed-forward slab.  All folds are exact matrix algebra (only f32 rounding)."""
    E, H, PW = EMBED_DIM, HEAD_DIM, PRED_WINDOW
    scale = np.float32(1.0 / np.sqrt(E))

    bz = p["bp"] + p["pos"]                     # positional embed folded into bias
    wq = (p["wp"] @ p["wq"]) * scale            # Wp and 1/sqrt(E) folded into Wq
    bq = (bz @ p["wq"] + p["bq"]) * scale
    wk = p["wp"] @ p["wk"]
    bk = bz @ p["wk"] + p["bk"]
    wvo = p["wv"] @ p["wo"]                     # out_proj folded into V (exact)
    wv = p["wp"] @ wvo
    bv = bz @ wvo + p["bv"] @ p["wo"]

    P = jnp.zeros((P_ROWS, P_COLS), jnp.float32)
    P = P.at[R_FW:R_FW + E, C_Z:C_Z + E].set(p["wp"])
    P = P.at[R_FW:R_FW + E, C_Q:C_Q + E].set(wq)
    P = P.at[R_FW:R_FW + E, C_K:C_K + E].set(wk)
    P = P.at[R_FW:R_FW + E, C_V:C_V + E].set(wv)
    P = P.at[R_FB, C_Z:C_Z + E].set(bz[0])
    P = P.at[R_FB, C_Q:C_Q + E].set(bq[0])
    P = P.at[R_FB, C_K:C_K + E].set(bk[0])
    P = P.at[R_FB, C_V:C_V + E].set(bv[0])
    P = P.at[R_BO, 0:E].set(p["bo"][0])
    P = P.at[R_G1, 0:E].set(p["g1"][0])
    P = P.at[R_BE1, 0:E].set(p["be1"][0])
    P = P.at[R_B2, 0:E].set(p["b2"][0])
    P = P.at[R_G2, 0:E].set(p["g2"][0])
    P = P.at[R_BE2, 0:E].set(p["be2"][0])
    P = P.at[R_WH1:R_WH1 + E, 0:H].set(p["wh1"])
    P = P.at[R_BH1, 0:H].set(p["bh1"][0])
    P = P.at[R_WH2:R_WH2 + H, 0:H].set(p["wh2"])
    P = P.at[R_BH2, 0:H].set(p["bh2"][0])
    P = P.at[R_WH3:R_WH3 + PW, 0:H].set(p["wh3"].T)
    P = P.at[R_BH3:R_BH3 + PW, 0].set(p["bh3"][0, :])      # (PW,1) bias column

    FF = jnp.zeros((FF_ROWS, DIM_FF), jnp.bfloat16)
    FF = FF.at[RF_W1:RF_W1 + E, :].set(p["w1"].astype(jnp.bfloat16))
    FF = FF.at[RF_W2T:RF_W2T + E, :].set(p["w2"].T.astype(jnp.bfloat16))
    FF = FF.at[RF_B1, :].set(p["b1"][0].astype(jnp.bfloat16))
    return P, FF


@jax.jit
def transformer_forward(x, packed):
    p_slab, ff_slab = packed
    b = x.shape[0]
    x2 = x.reshape(b, -1).astype(jnp.float32)    # nn.Flatten(1)
    vmem = lambda: pl.BlockSpec(memory_space=pltpu.MemorySpace.VMEM)
    out = pl.pallas_call(
        transformer_kernel,
        out_shape=jax.ShapeDtypeStruct((PRED_WINDOW, b), jnp.float32),
        in_specs=[vmem(), vmem(), vmem()],       # x, small-param slab, FF slab
        out_specs=vmem(),
    )(x2, p_slab, ff_slab)
    # lane-dense (pred_window, B) -> module's z.squeeze(1): (B,)
    return out[0, :]


def reference_forward(x, p):
    """Plain-JAX f32 reference with identical math (PyTorch semantics)."""
    b = x.shape[0]
    z = x.reshape(b, -1).astype(jnp.float32) @ p["wp"] + p["bp"] + p["pos"]
    q = (z @ p["wq"] + p["bq"]) / np.sqrt(EMBED_DIM)
    k = z @ p["wk"] + p["bk"]
    v = z @ p["wv"] + p["bv"]
    a = jax.nn.softmax(q @ k.T, axis=-1)
    attn = (a @ v) @ p["wo"] + p["bo"]

    def ln(t, g, be):
        m = jnp.mean(t, -1, keepdims=True)
        var = jnp.mean(jnp.square(t - m), -1, keepdims=True)
        return (t - m) / jnp.sqrt(var + LN_EPS) * g + be

    z = ln(z + attn, p["g1"], p["be1"])
    h = jax.nn.gelu(z @ p["w1"] + p["b1"], approximate=False) @ p["w2"] + p["b2"]
    z = ln(z + h, p["g2"], p["be2"])
    h = jnp.maximum(z @ p["wh1"] + p["bh1"], 0.0)
    h = jnp.maximum(h @ p["wh2"] + p["bh2"], 0.0)
    out = h @ p["wh3"] + p["bh3"]
    return out[:, 0]


if __name__ == "__main__":
    key = jax.random.PRNGKey(0)
    kx, kp = jax.random.split(key)
    # input: (batch=8, 3, 3) -> Flatten(1) -> (8, 9); attention runs over the 8 rows.
    x = jax.random.normal(kx, (8, 3, 3), jnp.float32)
    params = init_params(kp)
    packed = pack_params(params)

    out = transformer_forward(x, packed)
    jax.block_until_ready(out)

    ref = reference_forward(x, params)
    np.testing.assert_allclose(np.asarray(out), np.asarray(ref), rtol=1e-2, atol=1e-2)
    assert out.shape == (8,)
    print("KERNEL_OK")
</pallas_src>

<mosaic_0001>
module attributes {stable_mosaic.version = 11 : i64} {
  func.func @transformer_kernel(%arg0: memref<8x9xf32, #tpu.memory_space<vmem>>, %arg1: memref<40x512xf32, #tpu.memory_space<vmem>>, %arg2: memref<48x2048xbf16, #tpu.memory_space<vmem>>, %arg3: memref<1x8xf32, #tpu.memory_space<vmem>>) attributes {dimension_semantics = [], scalar_prefetch = 0 : i64, scratch_operands = 0 : i64, tpu.core_type = #tpu.core_type<tc>} {
    %c0 = arith.constant 0 : index
    %c0_0 = arith.constant 0 : index
    %0 = vector.load %arg0[%c0, %c0_0] : memref<8x9xf32, #tpu.memory_space<vmem>>, vector<8x9xf32>
    %c0_1 = arith.constant 0 : index
    %c0_2 = arith.constant 0 : index
    %1 = vector.load %arg1[%c0_1, %c0_2] : memref<40x512xf32, #tpu.memory_space<vmem>>, vector<9x512xf32>
    %cst = arith.constant dense<0.000000e+00> : vector<8x512xf32>
    %2 = tpu.matmul %0, %1, %cst {dimension_numbers = #tpu.dot_dimension_numbers<[1], [0], [0], [1], [0, 0, 1, 1], [], []>} : vector<8x9xf32>, vector<9x512xf32>, vector<8x512xf32> -> vector<8x512xf32>
    %c9 = arith.constant 9 : index
    %c0_3 = arith.constant 0 : index
    %3 = vector.load %arg1[%c9, %c0_3] : memref<40x512xf32, #tpu.memory_space<vmem>>, vector<1x512xf32>
    %4 = vector.broadcast %3 : vector<1x512xf32> to vector<8x512xf32>
    %5 = arith.addf %2, %4 : vector<8x512xf32>
    %6 = vector.extract_strided_slice %5 {offsets = [0, 0], sizes = [8, 9], strides = [1, 1]} : vector<8x512xf32> to vector<8x9xf32>
    %7 = vector.extract_strided_slice %5 {offsets = [0, 128], sizes = [8, 9], strides = [1, 1]} : vector<8x512xf32> to vector<8x9xf32>
    %8 = vector.extract_strided_slice %5 {offsets = [0, 256], sizes = [8, 9], strides = [1, 1]} : vector<8x512xf32> to vector<8x9xf32>
    %9 = vector.extract_strided_slice %5 {offsets = [0, 384], sizes = [8, 9], strides = [1, 1]} : vector<8x512xf32> to vector<8x9xf32>
    %cst_4 = arith.constant dense<0.000000e+00> : vector<8x8xf32>
    %10 = tpu.matmul %7, %8, %cst_4 {dimension_numbers = #tpu.dot_dimension_numbers<[1], [1], [0], [0], [0, 0, 1, 0], [], []>} : vector<8x9xf32>, vector<8x9xf32>, vector<8x8xf32> -> vector<8x8xf32>
    %cst_5 = arith.constant dense<0xFF800000> : vector<8xf32>
    %11 = vector.multi_reduction <maximumf>, %10, %cst_5 [1] : vector<8x8xf32> to vector<8xf32>
    %12 = vector.shape_cast %11 : vector<8xf32> to vector<8x1xf32>
    %13 = vector.broadcast %12 : vector<8x1xf32> to vector<8x8xf32>
    %14 = arith.subf %10, %13 : vector<8x8xf32>
    %15 = math.exp %14 : vector<8x8xf32>
    %cst_6 = arith.constant dense<0.000000e+00> : vector<8xf32>
    %16 = vector.multi_reduction <add>, %15, %cst_6 [1] : vector<8x8xf32> to vector<8xf32>
    %17 = vector.shape_cast %16 : vector<8xf32> to vector<8x1xf32>
    %18 = tpu.reciprocal %17 {approx = true} : vector<8x1xf32> -> vector<8x1xf32>
    %19 = vector.broadcast %18 : vector<8x1xf32> to vector<8x8xf32>
    %20 = arith.mulf %15, %19 : vector<8x8xf32>
    %cst_7 = arith.constant dense<0.000000e+00> : vector<8x9xf32>
    %21 = tpu.matmul %20, %9, %cst_7 {dimension_numbers = #tpu.dot_dimension_numbers<[1], [0], [0], [1], [0, 0, 1, 1], [], []>} : vector<8x8xf32>, vector<8x9xf32>, vector<8x9xf32> -> vector<8x9xf32>
    %c10 = arith.constant 10 : index
    %c0_8 = arith.constant 0 : index
    %22 = vector.load %arg1[%c10, %c0_8] : memref<40x512xf32, #tpu.memory_space<vmem>>, vector<1x9xf32>
    %23 = vector.broadcast %22 : vector<1x9xf32> to vector<8x9xf32>
    %24 = arith.addf %21, %23 : vector<8x9xf32>
    %25 = arith.addf %6, %24 : vector<8x9xf32>
    %c11 = arith.constant 11 : index
    %c0_9 = arith.constant 0 : index
    %26 = vector.load %arg1[%c11, %c0_9] : memref<40x512xf32, #tpu.memory_space<vmem>>, vector<1x9xf32>
    %c12 = arith.constant 12 : index
    %c0_10 = arith.constant 0 : index
    %27 = vector.load %arg1[%c12, %c0_10] : memref<40x512xf32, #tpu.memory_space<vmem>>, vector<1x9xf32>
    %cst_11 = arith.constant dense<0.000000e+00> : vector<8xf32>
    %28 = vector.multi_reduction <add>, %25, %cst_11 [1] : vector<8x9xf32> to vector<8xf32>
    %29 = vector.shape_cast %28 : vector<8xf32> to vector<8x1xf32>
    %cst_12 = arith.constant 9.000000e+00 : f32
    %30 = vector.broadcast %cst_12 : f32 to vector<8x1xf32>
    %31 = arith.divf %29, %30 : vector<8x1xf32>
    %32 = vector.broadcast %31 : vector<8x1xf32> to vector<8x9xf32>
    %33 = arith.subf %25, %32 : vector<8x9xf32>
    %34 = arith.mulf %33, %33 : vector<8x9xf32>
    %cst_13 = arith.constant dense<0.000000e+00> : vector<8xf32>
    %35 = vector.multi_reduction <add>, %34, %cst_13 [1] : vector<8x9xf32> to vector<8xf32>
    %36 = vector.shape_cast %35 : vector<8xf32> to vector<8x1xf32>
    %cst_14 = arith.constant 9.000000e+00 : f32
    %37 = vector.broadcast %cst_14 : f32 to vector<8x1xf32>
    %38 = arith.divf %36, %37 : vector<8x1xf32>
    %39 = vector.broadcast %31 : vector<8x1xf32> to vector<8x9xf32>
    %40 = arith.subf %25, %39 : vector<8x9xf32>
    %cst_15 = arith.constant 9.99999974E-6 : f32
    %41 = vector.broadcast %cst_15 : f32 to vector<8x1xf32>
    %42 = arith.addf %38, %41 : vector<8x1xf32>
    %43 = math.rsqrt %42 : vector<8x1xf32>
    %44 = vector.broadcast %43 : vector<8x1xf32> to vector<8x9xf32>
    %45 = arith.mulf %40, %44 : vector<8x9xf32>
    %46 = vector.broadcast %26 : vector<1x9xf32> to vector<8x9xf32>
    %47 = arith.mulf %45, %46 : vector<8x9xf32>
    %48 = vector.broadcast %27 : vector<1x9xf32> to vector<8x9xf32>
    %49 = arith.addf %47, %48 : vector<8x9xf32>
    %50 = arith.truncf %49 : vector<8x9xf32> to vector<8x9xbf16>
    %c0_16 = arith.constant 0 : index
    %c0_17 = arith.constant 0 : index
    %51 = vector.load %arg2[%c0_16, %c0_17] : memref<48x2048xbf16, #tpu.memory_space<vmem>>, vector<9x2048xbf16>
    %cst_18 = arith.constant dense<0.000000e+00> : vector<8x2048xf32>
    %52 = tpu.matmul %50, %51, %cst_18 {dimension_numbers = #tpu.dot_dimension_numbers<[1], [0], [0], [1], [0, 0, 1, 1], [], []>} : vector<8x9xbf16>, vector<9x2048xbf16>, vector<8x2048xf32> -> vector<8x2048xf32>
    %c32 = arith.constant 32 : index
    %c0_19 = arith.constant 0 : index
    %53 = vector.load %arg2[%c32, %c0_19] : memref<48x2048xbf16, #tpu.memory_space<vmem>>, vector<1x2048xbf16>
    %54 = arith.extf %53 : vector<1x2048xbf16> to vector<1x2048xf32>
    %55 = vector.broadcast %54 : vector<1x2048xf32> to vector<8x2048xf32>
    %56 = arith.addf %52, %55 : vector<8x2048xf32>
    %57 = arith.truncf %56 : vector<8x2048xf32> to vector<8x2048xbf16>
    %cst_20 = arith.constant 5.000000e-01 : bf16
    %58 = vector.broadcast %cst_20 : bf16 to vector<8x2048xbf16>
    %59 = arith.mulf %58, %57 : vector<8x2048xbf16>
    %cst_21 = arith.constant 7.070310e-01 : bf16
    %60 = vector.broadcast %cst_21 : bf16 to vector<8x2048xbf16>
    %61 = arith.mulf %57, %60 : vector<8x2048xbf16>
    %62 = math.erf %61 : vector<8x2048xbf16>
    %cst_22 = arith.constant 1.000000e+00 : bf16
    %63 = vector.broadcast %cst_22 : bf16 to vector<8x2048xbf16>
    %64 = arith.addf %63, %62 : vector<8x2048xbf16>
    %65 = arith.mulf %59, %64 : vector<8x2048xbf16>
    %c16 = arith.constant 16 : index
    %c0_23 = arith.constant 0 : index
    %66 = vector.load %arg2[%c16, %c0_23] : memref<48x2048xbf16, #tpu.memory_space<vmem>>, vector<9x2048xbf16>
    %cst_24 = arith.constant dense<0.000000e+00> : vector<8x9xf32>
    %67 = tpu.matmul %65, %66, %cst_24 {dimension_numbers = #tpu.dot_dimension_numbers<[1], [1], [0], [0], [0, 0, 1, 0], [], []>} : vector<8x2048xbf16>, vector<9x2048xbf16>, vector<8x9xf32> -> vector<8x9xf32>
    %c13 = arith.constant 13 : index
    %c0_25 = arith.constant 0 : index
    %68 = vector.load %arg1[%c13, %c0_25] : memref<40x512xf32, #tpu.memory_space<vmem>>, vector<1x9xf32>
    %69 = vector.broadcast %68 : vector<1x9xf32> to vector<8x9xf32>
    %70 = arith.addf %67, %69 : vector<8x9xf32>
    %71 = arith.addf %49, %70 : vector<8x9xf32>
    %c14 = arith.constant 14 : index
    %c0_26 = arith.constant 0 : index
    %72 = vector.load %arg1[%c14, %c0_26] : memref<40x512xf32, #tpu.memory_space<vmem>>, vector<1x9xf32>
    %c15 = arith.constant 15 : index
    %c0_27 = arith.constant 0 : index
    %73 = vector.load %arg1[%c15, %c0_27] : memref<40x512xf32, #tpu.memory_space<vmem>>, vector<1x9xf32>
    %cst_28 = arith.constant dense<0.000000e+00> : vector<8xf32>
    %74 = vector.multi_reduction <add>, %71, %cst_28 [1] : vector<8x9xf32> to vector<8xf32>
    %75 = vector.shape_cast %74 : vector<8xf32> to vector<8x1xf32>
    %cst_29 = arith.constant 9.000000e+00 : f32
    %76 = vector.broadcast %cst_29 : f32 to vector<8x1xf32>
    %77 = arith.divf %75, %76 : vector<8x1xf32>
    %78 = vector.broadcast %77 : vector<8x1xf32> to vector<8x9xf32>
    %79 = arith.subf %71, %78 : vector<8x9xf32>
    %80 = arith.mulf %79, %79 : vector<8x9xf32>
    %cst_30 = arith.constant dense<0.000000e+00> : vector<8xf32>
    %81 = vector.multi_reduction <add>, %80, %cst_30 [1] : vector<8x9xf32> to vector<8xf32>
    %82 = vector.shape_cast %81 : vector<8xf32> to vector<8x1xf32>
    %cst_31 = arith.constant 9.000000e+00 : f32
    %83 = vector.broadcast %cst_31 : f32 to vector<8x1xf32>
    %84 = arith.divf %82, %83 : vector<8x1xf32>
    %85 = vector.broadcast %77 : vector<8x1xf32> to vector<8x9xf32>
    %86 = arith.subf %71, %85 : vector<8x9xf32>
    %cst_32 = arith.constant 9.99999974E-6 : f32
    %87 = vector.broadcast %cst_32 : f32 to vector<8x1xf32>
    %88 = arith.addf %84, %87 : vector<8x1xf32>
    %89 = math.rsqrt %88 : vector<8x1xf32>
    %90 = vector.broadcast %89 : vector<8x1xf32> to vector<8x9xf32>
    %91 = arith.mulf %86, %90 : vector<8x9xf32>
    %92 = vector.broadcast %72 : vector<1x9xf32> to vector<8x9xf32>
    %93 = arith.mulf %91, %92 : vector<8x9xf32>
    %94 = vector.broadcast %73 : vector<1x9xf32> to vector<8x9xf32>
    %95 = arith.addf %93, %94 : vector<8x9xf32>
    %c16_33 = arith.constant 16 : index
    %c0_34 = arith.constant 0 : index
    %96 = vector.load %arg1[%c16_33, %c0_34] : memref<40x512xf32, #tpu.memory_space<vmem>>, vector<9x4xf32>
    %cst_35 = arith.constant dense<0.000000e+00> : vector<8x4xf32>
    %97 = tpu.matmul %95, %96, %cst_35 {dimension_numbers = #tpu.dot_dimension_numbers<[1], [0], [0], [1], [0, 0, 1, 1], [], []>} : vector<8x9xf32>, vector<9x4xf32>, vector<8x4xf32> -> vector<8x4xf32>
    %c25 = arith.constant 25 : index
    %c0_36 = arith.constant 0 : index
    %98 = vector.load %arg1[%c25, %c0_36] : memref<40x512xf32, #tpu.memory_space<vmem>>, vector<1x4xf32>
    %99 = vector.broadcast %98 : vector<1x4xf32> to vector<8x4xf32>
    %100 = arith.addf %97, %99 : vector<8x4xf32>
    %cst_37 = arith.constant 0.000000e+00 : f32
    %101 = vector.broadcast %cst_37 : f32 to vector<8x4xf32>
    %102 = arith.maximumf %100, %101 : vector<8x4xf32>
    %c32_38 = arith.constant 32 : index
    %c0_39 = arith.constant 0 : index
    %103 = vector.load %arg1[%c32_38, %c0_39] : memref<40x512xf32, #tpu.memory_space<vmem>>, vector<4x4xf32>
    %cst_40 = arith.constant dense<0.000000e+00> : vector<8x4xf32>
    %104 = tpu.matmul %102, %103, %cst_40 {dimension_numbers = #tpu.dot_dimension_numbers<[1], [0], [0], [1], [0, 0, 1, 1], [], []>} : vector<8x4xf32>, vector<4x4xf32>, vector<8x4xf32> -> vector<8x4xf32>
    %c36 = arith.constant 36 : index
    %c0_41 = arith.constant 0 : index
    %105 = vector.load %arg1[%c36, %c0_41] : memref<40x512xf32, #tpu.memory_space<vmem>>, vector<1x4xf32>
    %106 = vector.broadcast %105 : vector<1x4xf32> to vector<8x4xf32>
    %107 = arith.addf %104, %106 : vector<8x4xf32>
    %cst_42 = arith.constant 0.000000e+00 : f32
    %108 = vector.broadcast %cst_42 : f32 to vector<8x4xf32>
    %109 = arith.maximumf %107, %108 : vector<8x4xf32>
    %c37 = arith.constant 37 : index
    %c0_43 = arith.constant 0 : index
    %110 = vector.load %arg1[%c37, %c0_43] : memref<40x512xf32, #tpu.memory_space<vmem>>, vector<1x4xf32>
    %cst_44 = arith.constant dense<0.000000e+00> : vector<1x8xf32>
    %111 = tpu.matmul %110, %109, %cst_44 {dimension_numbers = #tpu.dot_dimension_numbers<[1], [1], [0], [0], [0, 0, 1, 0], [], []>} : vector<1x4xf32>, vector<8x4xf32>, vector<1x8xf32> -> vector<1x8xf32>
    %c38 = arith.constant 38 : index
    %c0_45 = arith.constant 0 : index
    %112 = vector.load %arg1[%c38, %c0_45] : memref<40x512xf32, #tpu.memory_space<vmem>>, vector<1x1xf32>
    %113 = vector.broadcast %112 : vector<1x1xf32> to vector<1x8xf32>
    %114 = arith.addf %111, %113 : vector<1x8xf32>
    %c0_46 = arith.constant 0 : index
    %c0_47 = arith.constant 0 : index
    %115 = vector.load %arg3[%c0_46, %c0_47] : memref<1x8xf32, #tpu.memory_space<vmem>>, vector<1x8xf32>
    tpu.vector_store %arg3[%c0_46, %c0_47], %114 {strides = array<i32>} : memref<1x8xf32, #tpu.memory_space<vmem>>, vector<1x8xf32>,
    return
  }
}

</mosaic_0001>

<bundles_post_ra>
// kernel: transformer_forward.1
= control target key start
LH: loop header
LB: loop body
LE: loop exit
PB: predicated region body
PF: predicated region fallthrough
CT: control target
= control target key end

     0   :  { %8 = vsyncpa [#allocation3], 0  ;;  %s2223_s0 = inlined_call_operand.vmem [shape: f32[8,9], index: 0, kind: input, shape index: {}]   ;;  %s2224_s1 = inlined_call_operand.hbm [shape: f32[40,512], index: 1, kind: input, shape index: {}]   ;;  %s2225_s2 = inlined_call_operand.hbm [shape: bf16[48,2048], index: 2, kind: input, shape index: {}]   ;;  %s2226_s3 = inlined_call_operand.hbm [shape: f32[1,8], index: 3, kind: output, shape index: {}]  }
   0x1   :  { %9 = vsyncpa [#allocation6], 0 }
   0x2   :  { %10 = vsyncpa [#allocation4], 0  ;;  %s1974_s12 = smov [#allocation2]  }
   0x3   :  { %s18_s13 = sshll.u32 %s1974_s12, 4  ;;  %s19_s13 = int_to_ptr.vmem [resolvable:$true] %s18_s13 }
   0x4   :  { %s1916_s14 = scalar_lea.vmem %s19_s13, 2560  ;;  %p1921_p1 = scmp.lt.s32.totalorder %s19_s13, %s19_s13 }
   0x5   :  { %p1917_p0 = scmp.ne.s32.totalorder %s19_s13, %s1916_s14  ;;  %p1922_p2 = scmp.lt.s32.totalorder %s1916_s14, %s1916_s14 }
   0x7   :  { %p1923_p3 = por %p1922_p2, %p1921_p1 }
   0x9   :  { %p1924_p4 = pnand %p1923_p3, %p1917_p0 }
   0xb   :  { %1927 = shalt.err (!%p1924_p4)
}
   0xc   :  { %s1975_s15 = smov 512   ;;  %s1976_s16 = smov 32  }
   0xd   :  { %24 = dma.hbm_to_vmem [thread:$0]  %s2224_s1, 2560, %s19_s13, [#allocation3], %s1975_s15, %s1975_s15, %s1976_s16  }
   0xe   :  { %s1977_s19 = smov [#allocation5]  }
   0xf   :  { %s30_s20 = sshll.u32 %s1977_s19, 4  ;;  %s31_s20 = int_to_ptr.vmem [resolvable:$true] %s30_s20 }
  0x10   :  { %s1936_s21 = scalar_lea.vmem %s31_s20, 6144  ;;  %p1941_p6 = scmp.lt.s32.totalorder %s31_s20, %s31_s20 }
  0x11   :  { %p1937_p5 = scmp.ne.s32.totalorder %s31_s20, %s1936_s21  ;;  %p1942_p7 = scmp.lt.s32.totalorder %s1936_s21, %s1936_s21 }
  0x13   :  { %p1943_p8 = por %p1942_p7, %p1941_p6 }
  0x15   :  { %p1944_p9 = pnand %p1943_p8, %p1937_p5 }
  0x17   :  { %1947 = shalt.err (!%p1944_p9)
}
  0x18   :  { %s1978_s22 = smov 1024   ;;  %s1979_s23 = smov 64  }
  0x19   :  { %36 = dma.hbm_to_vmem [thread:$0]  %s2225_s2, 6144, %s31_s20, [#allocation6], %s1978_s22, %s1978_s22, %s1979_s23  }
  0x1a   :  { %1968 = dma.done.wait [#allocation3], 2560  }
  0x1b   :  { %1969 = vsyncadd [#allocation3], 4294964736 }
  0x1c   :  { %1970 = dma.done.wait [#allocation6], 6144  }
  0x1d   :  { %1971 = vsyncadd [#allocation6], 4294961152  ;;  %v1980_v0 = vmov 0.0   ;;  %vm83_vm0 = vcmask 1040384   ;;  %v53_v1 = vld [vmem:[#allocation2 + $0x28] sm:$0x1]  ;;  %v59_v10 = vlaneseq }
  0x1e   :  { %160 = vmatprep.mubr.f32.mxu0 %v1980_v0  ;;  %231 = vmatprep.mubr.f32.mxu1 %v1980_v0  ;;  %v55_v2 = vld [vmem:[#allocation2 + $0x38] sm:$0x1]  ;;  %v52_v3 = vld [vmem:[#allocation2 + $0x20] sm:$0x1]  ;;  %v54_v4 = vld [vmem:[#allocation2 + $0x30] sm:$0x1] }
  0x1f   :  { %1763 = vmatprep.subr.msk.mxu0 %vm83_vm0, %v53_v1  ;;  %1766 = vmatprep.subr.msk.mxu1 %vm83_vm0, %v55_v2  ;;  %v49_v5 = vld [vmem:[#allocation2 + $0x8] sm:$0xff]  ;;  %v51_v6 = vld [vmem:[#allocation2 + $0x18] sm:$0xff]  ;;  %v48_v7 = vld [vmem:[#allocation2] sm:$0xff]  ;;  %vm79_vm1 = vcmask 72704   ;;  %vm1981_vm2 = vmmov 0   ;;  %v60_v11 = vshrl.u32 %v59_v10, 7 }
  0x20   :  { %1764 = vmatpush1.msk.msra.mxu0 %vm83_vm0, %v52_v3  ;;  %1767 = vmatpush1.msk.msra.mxu1 %vm83_vm0, %v54_v4  ;;  %v50_v8 = vld [vmem:[#allocation2 + $0x10] sm:$0xff]  ;;  %v47_v9 = vld [vmem:[%s2223_s0] sm:$0xff]  ;;  %vm314_vm3 = vcmask 64512   ;;  %vm591_vm4 = vcmask 1043456   ;;  %v421_v53 = vld [vmem:[#allocation5 + $0x8] sm:$0xff]  ;;  %vm592_vm5 = vcmask 1044480  }
  0x21   :  { %126 = vmatprep.subr.mxu0 %v49_v5  ;;  %197 = vmatprep.subr.mxu1 %v51_v6  ;;  %v69_v12 = vsub.s32 2, %v60_v11  ;;  %v57_v13 = vld [vmem:[#allocation2 + $0x21] ss:$8 sm:$0xf]  ;;  %v65_v14 = vsub.s32 1, %v60_v11  ;;  %v73_v15 = vsub.s32 3, %v60_v11 }
  0x22   :  { %127 = vmatpush1.msra.mxu0 %v48_v7  ;;  %198 = vmatpush1.msra.mxu1 %v50_v8  ;;  %v2033_v37 = vsub.s32 0, %v60_v11  ;;  %v326_v39 = vld [vmem:[#allocation2 + $0x22] ss:$0 sm:$0xff]  ;;  %v428_v52 = vld [vmem:[#allocation5 + $0x40] sm:$0x11]  ;;  %v1982_v55 = vmov 65535  }
  0x23   :  { %1765 = vmatmul.mubr.msk.f32.vlgmr.msra.gmra.mxu0 %vm79_vm1, %v47_v9  ;;  %1768 = vmatmul.mubr.msk.f32.vlgmr.msra.gmra.mxu1 %vm79_vm1, %v47_v9  ;;  %v70_v16 = vrot.slane %v57_v13, %v69_v12  ;;  %v66_v17 = vrot.slane %v57_v13, %v65_v14  ;;  %v74_v18 = vrot.slane %v57_v13, %v73_v15  ;;  %v420_v51 = vld [vmem:[#allocation5] sm:$0xff]  ;;  %v593_v56 = vsel %vm591_vm4, 4294967295, %v1982_v55  ;;  %v429_v57 = vld [vmem:[#allocation5 + $0x48] sm:$0x11]  ;;  %v422_v4 = vld [vmem:[#allocation5 + $0x10] sm:$0xff]  ;;  %s1984_s0 = smov [#allocation7]  }
  0x24   :  { %1829 = vmatprep.subr.mxu0 %v1980_v0  ;;  %1834 = vmatprep.subr.mxu1 %v1980_v0  ;;  %v62_v38 = vrot.slane %v57_v13, %v2033_v37  ;;  %v1773_v54 = vcombine.high %v420_v51, %v428_v52  ;;  %v1772_v58 = vcombine.low %v420_v51, %v428_v52  ;;  %v2039_v59 = vsel %vm592_vm5, %v593_v56, 0  ;;  %v430_v5 = vld [vmem:[#allocation5 + $0x50] sm:$0x11]  ;;  %v423_v6 = vld [vmem:[#allocation5 + $0x18] sm:$0xff]  ;;  %v1067_v51 = vld [vmem:[#allocation5 + $0x80] sm:$0xff]  ;;  %s1753_s26 = sshll.u32 %s1984_s0, 4  ;;  %s1754_s26 = int_to_ptr.vmem [resolvable:$true] %s1753_s26 }
  0x25   :  { %1831 = vmatprep.mubr.msk.f32.mxu0 %vm1981_vm2, %v1980_v0  ;;  %1836 = vmatprep.mubr.msk.f32.mxu1 %vm1981_vm2, %v1980_v0  ;;  %v1774_v60 = vcombine.low %v421_v53, %v429_v57  ;;  %v1775_v61 = vcombine.high %v421_v53, %v429_v57  ;;  %v1983_v3 = vmov 0   ;;  %v1776_v7 = vcombine.low %v422_v4, %v430_v5  ;;  %v431_v9 = vld [vmem:[#allocation5 + $0x58] sm:$0x11]  ;;  %v1075_v52 = vld [vmem:[#allocation5 + $0xc0] sm:$0x11]  ;;  %v1068_v53 = vld [vmem:[#allocation5 + $0x88] sm:$0xff]  ;;  %p1953_p11 = scmp.lt.s32.totalorder %s1754_s26, %s1754_s26 }
  0x26   :  { %v599_v62 = vand.u32 %v1773_v54, %v2039_v59  ;;  %v596_v1 = vand.u32 %v1772_v58, %v2039_v59  ;;  %v1777_v8 = vcombine.high %v422_v4, %v430_v5  ;;  %1867 = vset.pattern.permute.xlu0 %v1983_v3  ;;  %v1778_v10 = vcombine.low %v423_v6, %v431_v9  ;;  %v1076_v55 = vld [vmem:[#allocation5 + $0xc8] sm:$0x11]  ;;  %v436_v4 = vld [vmem:[#allocation5 + $0x100] sm:$0x11]  ;;  %s1948_s27 = scalar_lea.vmem %s1754_s26, 16  ;;  %s1952_s28 = scalar_lea.vmem %s1754_s26, 32 }
  0x27   :  { %v605_v63 = vand.u32 %v1775_v61, %v2039_v59  ;;  %v602_v2 = vand.u32 %v1774_v60, %v2039_v59  ;;  %v1779_v11 = vcombine.high %v423_v6, %v431_v9  ;;  %v608_v13 = vand.u32 %v1776_v7, %v2039_v59  ;;  %v2080_v60 = vld [vmem:[#allocation5 + $0xd0] sm:$0x11]  ;;  %v2082_v61 = vld [vmem:[#allocation5 + $0x98] sm:$0xff]  ;;  %v437_v5 = vld [vmem:[#allocation5 + $0x108] sm:$0x11]  ;;  %p1949_p10 = scmp.ne.s32.totalorder %s1754_s26, %s1948_s27  ;;  %p1954_p12 = scmp.lt.s32.totalorder %s1952_s28, %s1948_s27 }
  0x28   :  { %v611_v12 = vand.u32 %v1777_v8, %v2039_v59  ;;  %v614_v15 = vand.u32 %v1778_v10, %v2039_v59  ;;  %v1797_v54 = vcombine.high %v1067_v51, %v1075_v52  ;;  %v1796_v56 = vcombine.low %v1067_v51, %v1075_v52 }
  0x29   :  { %v617_v14 = vand.u32 %v1779_v11, %v2039_v59  ;;  %v1798_v57 = vcombine.low %v1068_v53, %v1076_v55  ;;  %v1799_v58 = vcombine.high %v1068_v53, %v1076_v55  ;;  %v444_v6 = vunpack.c.l.bf16 %v436_v4  ;;  %p1955_p13 = por %p1954_p12, %p1953_p11 }
  0x2a   :  { %v446_v7 = vunpack.c.l.bf16 %v437_v5  ;;  %v445_v8 = vunpack.c.h.bf16 %v436_v4  ;;  %v447_v9 = vunpack.c.h.bf16 %v437_v5  ;;  %vm1584_vm6 = vcmask 31744  }
  0x2b   :  { %v463_v10 = vrot.slane %v444_v6, %v2033_v37  ;;  %vm1745_vm7 = vcmask 57344   ;;  %p1956_p0 = pnand %p1955_p13, %p1949_p10 }
  0x2c   :  { %v471_v11 = vrot.slane %v446_v7, %v2033_v37 }
  0xe3   :  { %v162_v19 = vpop.f32.mrf.mxu0  ;;  %v233_v20 = vpop.f32.mrf.mxu1 }
  0xe4   :  { %v234_v21 = vadd.f32 %v233_v20, %v70_v16  ;;  %v163_v41 = vadd.f32 %v162_v19, %v62_v38  ;;  %v401_v20 = vld [vmem:[#allocation2 + $0x23] ss:$0 sm:$0xff]  ;;  %v435_v38 = vld [vmem:[#allocation5 + $0x78] sm:$0x11] }
  0xe5   :  { %v164_v22 = vpop.f32.mrf.mxu0  ;;  %v235_v23 = vpop.f32.mrf.mxu1 }
  0xe6   :  { %v165_v24 = vadd.f32 %v164_v22, %v66_v17  ;;  %v236_v25 = vadd.f32 %v235_v23, %v74_v18  ;;  %1830 = vmatpush3.xpose.msk.msra.mxu0 %vm79_vm1, %v234_v21  ;;  %v424_v21 = vld [vmem:[#allocation5 + $0x20] sm:$0xff] }
  0xe7   :  { %657 = vmatprep.subr.bf16.mxu0 %v599_v62  ;;  %v432_v23 = vld [vmem:[#allocation5 + $0x60] sm:$0x11] }
  0xe8   :  { %1835 = vmatpush3.msra.mxu1 %v236_v25  ;;  %v433_v25 = vld [vmem:[#allocation5 + $0x68] sm:$0x11] }
  0xe9   :  { %1832 = vmatmul.mubr.msk.f32.vlgmr.msra.gmra.mxu0 %vm79_vm1, %v165_v24  ;;  %698 = vmatprep.subr.bf16.mxu1 %v605_v63  ;;  %v425_v24 = vld [vmem:[#allocation5 + $0x28] sm:$0xff]  ;;  %v2086_v63 = vld [vmem:[#allocation5 + $0xd8] sm:$0x11] }
  0xea   :  { %658 = vmatpush1.bf16.msra.mxu0 %v596_v1  ;;  %675 = vmatprep.mubr.bf16.mxu0 %v1983_v3 }
  0xeb   :  { %739 = vmatprep.subr.bf16.mxu0 %v611_v12  ;;  %v438_v12 = vld [vmem:[#allocation5 + $0x110] sm:$0x11] }
 0x1a9   :  { %v310_v26 = vpop.f32.mrf.mxu0 }
 0x1aa   :  { %v315_v27 = vsel %vm314_vm3, %v310_v26, -inf }
 0x1ab   :  { %316 = vmax.xlane.f32.xlu0 %v315_v27  ;;  %v1833_v28 = vpop.f32.mrf.mxu0 }
 0x1ac   :  { %v1781_v28 = vcombine.high %v424_v21, %v432_v23 }
 0x234   :  { %v317_v29 = vpop.xlane.xlu0 %316 }
 0x235   :  { %v318_v30 = vsub.f32 %v310_v26, %v317_v29  ;;  %v402_v26 = vld [vmem:[#allocation2 + $0x24] ss:$0 sm:$0xff]  ;;  %v1783_v29 = vcombine.high %v425_v24, %v433_v25 }
 0x237   :  { %v319_v31 = vmul.f32 1.442695, %v318_v30 }
 0x239   :  { %1868 = vpow2.f32 %v319_v31 }
 0x246   :  { %v1869_v32 = vpop.eup %1868 }
 0x247   :  { %v321_v33 = vsel %vm314_vm3, %v1869_v32, 0.0 }
 0x248   :  { %322 = vadd.xlane.f32.xlu0 %v321_v33  ;;  %v629_v33 = vand.u32 %v1783_v29, %v2039_v59 }
 0x2d1   :  { %v323_v34 = vpop.xlane.xlu0 %322 }
 0x2d2   :  { %1870 = vrcp.f32 %v323_v34  ;;  %v426_v34 = vld [vmem:[#allocation5 + $0x30] sm:$0xff] }
 0x2df   :  { %v1871_v35 = vpop.eup %1870 }
 0x2e0   :  { %v325_v36 = vmul.f32 %v1871_v35, %v1869_v32  ;;  %v623_v32 = vand.u32 %v1781_v28, %v2039_v59  ;;  %v434_v35 = vld [vmem:[#allocation5 + $0x70] sm:$0x11] }
 0x2e2   :  { %1837 = vmatmul.mubr.msk.f32.vlgmr.msra.gmra.mxu1 %vm314_vm3, %v325_v36  ;;  %v427_v36 = vld [vmem:[#allocation5 + $0x38] sm:$0xff] }
 0x2e3   :  { %699 = vmatpush1.bf16.msra.mxu1 %v602_v2  ;;  %716 = vmatprep.mubr.bf16.mxu1 %v1983_v3  ;;  %v1802_v2 = vcombine.low %v2082_v61, %v2086_v63 }
 0x2e4   :  { %780 = vmatprep.subr.bf16.mxu1 %v617_v14  ;;  %v467_v14 = vrot.slane %v445_v8, %v2033_v37 }
 0x3a2   :  { %v396_v40 = vpop.f32.mrf.mxu1 }
 0x3a3   :  { %v397_v42 = vadd.f32 %v396_v40, %v326_v39  ;;  %v1780_v39 = vcombine.low %v424_v21, %v432_v23  ;;  %v1782_v40 = vcombine.low %v425_v24, %v433_v25  ;;  %v449_v24 = vunpack.c.h.bf16 %v438_v12 }
 0x3a4   :  { %v1838_v43 = vpop.f32.mrf.mxu1 }
 0x3a5   :  { %v400_v44 = vadd.f32 %v397_v42, %v163_v41  ;;  %v1785_v41 = vcombine.high %v426_v34, %v434_v35  ;;  %v1787_v42 = vcombine.high %v427_v36, %v435_v38  ;;  %v620_v43 = vand.u32 %v1780_v39, %v2039_v59 }
 0x3a7   :  { %v403_v45 = vsel %vm79_vm1, %v400_v44, 0.0 }
 0x3a8   :  { %404 = vadd.xlane.f32.xlu1 %v403_v45  ;;  %v635_v45 = vand.u32 %v1785_v41, %v2039_v59 }
 0x431   :  { %v405_v46 = vpop.xlane.xlu1 %404 }
 0x432   :  { %v407_v47 = vmul.f32 0.11111111, %v405_v46  ;;  %v641_v46 = vand.u32 %v1787_v42, %v2039_v59 }
 0x434   :  { %v408_v48 = vsub.f32 %v400_v44, %v407_v47  ;;  %v626_v44 = vand.u32 %v1782_v40, %v2039_v59  ;;  %v1784_v47 = vcombine.low %v426_v34, %v434_v35 }
 0x436   :  { %v409_v49 = vmul.f32 %v408_v48, %v408_v48 }
 0x438   :  { %v410_v50 = vsel %vm79_vm1, %v409_v49, 0.0  ;;  %v632_v49 = vand.u32 %v1784_v47, %v2039_v59 }
 0x439   :  { %411 = vadd.xlane.f32.xlu1 %v410_v50 }
 0x4c2   :  { %v412_v16 = vpop.xlane.xlu1 %411 }
 0x4c3   :  { %v413_v17 = vmul.f32 0.11111111, %v412_v16 }
 0x4c5   :  { %v414_v18 = vadd.f32 1e-05, %v413_v17 }
 0x4c7   :  { %1872 = vrsqrt.f32 %v414_v18 }
 0x4d4   :  { %v1873_v19 = vpop.eup %1872 }
 0x4d5   :  { %v416_v22 = vmul.f32 %v1873_v19, %v408_v48  ;;  %v1786_v48 = vcombine.low %v427_v36, %v435_v38  ;;  %v440_v38 = vld [vmem:[#allocation5 + $0x120] sm:$0x11] }
 0x4d7   :  { %v417_v27 = vmul.f32 %v416_v22, %v401_v20  ;;  %v638_v50 = vand.u32 %v1786_v48, %v2039_v59  ;;  %v2078_v59 = vld [vmem:[#allocation5 + $0x90] sm:$0xff]  ;;  %v448_v20 = vunpack.c.l.bf16 %v438_v12 }
 0x4d8   :  { %v1801_v62 = vcombine.high %v2078_v59, %v2080_v60  ;;  %v1800_v1 = vcombine.low %v2078_v59, %v2080_v60 }
 0x4d9   :  { %v2052_v30 = vadd.f32 %v417_v27, %v402_v26  ;;  %v479_v35 = vrot.slane %v448_v20, %v2033_v37 }
 0x4db   :  { %v419_v31 = vpack.c.bf16 %v2052_v30, %v2052_v30 }
 0x4dd   :  { %1788 = vmatmul.mubr.msk.bf16.vlgmr.msra.gmra.mxu0 %vm79_vm1, %v419_v31  ;;  %1789 = vmatmul.mubr.msk.bf16.vlgmr.msra.gmra.mxu1 %vm79_vm1, %v419_v31 }
 0x4de   :  { %740 = vmatpush1.bf16.msra.mxu0 %v608_v13  ;;  %781 = vmatpush1.bf16.msra.mxu1 %v614_v15  ;;  %v439_v13 = vld [vmem:[#allocation5 + $0x118] sm:$0x11]  ;;  %v475_v15 = vrot.slane %v447_v9, %v2033_v37 }
 0x4df   :  { %757 = vmatprep.mubr.bf16.mxu0 %v1983_v3  ;;  %798 = vmatprep.mubr.bf16.mxu1 %v1983_v3  ;;  %v450_v21 = vunpack.c.l.bf16 %v439_v13  ;;  %v451_v25 = vunpack.c.h.bf16 %v439_v13 }
 0x4e0   :  { %821 = vmatprep.subr.bf16.mxu0 %v623_v32  ;;  %862 = vmatprep.subr.bf16.mxu1 %v629_v33 }
 0x4e1   :  { %v487_v36 = vrot.slane %v450_v21, %v2033_v37 }
 0x4e5   :  { %1790 = vmatmul.mubr.msk.bf16.vlgmr.msra.gmra.mxu0 %vm79_vm1, %v419_v31  ;;  %1791 = vmatmul.mubr.msk.bf16.vlgmr.msra.gmra.mxu1 %vm79_vm1, %v419_v31 }
 0x4e6   :  { %822 = vmatpush1.bf16.msra.mxu0 %v620_v43  ;;  %863 = vmatpush1.bf16.msra.mxu1 %v626_v44  ;;  %v441_v43 = vld [vmem:[#allocation5 + $0x128] sm:$0x11] }
 0x4e7   :  { %839 = vmatprep.mubr.bf16.mxu0 %v1983_v3  ;;  %880 = vmatprep.mubr.bf16.mxu1 %v1983_v3  ;;  %v454_v53 = vunpack.c.l.bf16 %v441_v43 }
 0x4e8   :  { %903 = vmatprep.subr.bf16.mxu0 %v635_v45  ;;  %944 = vmatprep.subr.bf16.mxu1 %v641_v46  ;;  %v483_v45 = vrot.slane %v449_v24, %v2033_v37  ;;  %v491_v46 = vrot.slane %v451_v25, %v2033_v37 }
 0x4ed   :  { %1792 = vmatmul.mubr.msk.bf16.vlgmr.msra.gmra.mxu0 %vm79_vm1, %v419_v31  ;;  %1793 = vmatmul.mubr.msk.bf16.vlgmr.msra.gmra.mxu1 %vm79_vm1, %v419_v31 }
 0x4ee   :  { %904 = vmatpush1.bf16.msra.mxu0 %v632_v49  ;;  %945 = vmatpush1.bf16.msra.mxu1 %v638_v50  ;;  %v452_v50 = vunpack.c.l.bf16 %v440_v38 }
 0x4ef   :  { %921 = vmatprep.mubr.bf16.mxu0 %v1983_v3  ;;  %962 = vmatprep.mubr.bf16.mxu1 %v1983_v3  ;;  %v1803_v3 = vcombine.high %v2082_v61, %v2086_v63 }
 0x4f0   :  { %1178 = vmatprep.subr.bf16.mxu0 %v1797_v54  ;;  %1218 = vmatprep.subr.bf16.mxu1 %v1799_v58  ;;  %v495_v9 = vrot.slane %v452_v50, %v2033_v37 }
 0x4f5   :  { %1794 = vmatmul.mubr.msk.bf16.vlgmr.msra.gmra.mxu0 %vm79_vm1, %v419_v31  ;;  %1795 = vmatmul.mubr.msk.bf16.vlgmr.msra.gmra.mxu1 %vm79_vm1, %v419_v31 }
 0x4f6   :  { %1179 = vmatpush1.bf16.xpose.msra.mxu0 %v1796_v56  ;;  %1219 = vmatpush1.bf16.xpose.msra.mxu1 %v1798_v57  ;;  %v453_v56 = vunpack.c.h.bf16 %v440_v38  ;;  %v455_v57 = vunpack.c.h.bf16 %v441_v43 }
 0x4f7   :  { %1258 = vmatprep.subr.bf16.mxu0 %v1801_v62  ;;  %1298 = vmatprep.subr.bf16.mxu1 %v1803_v3 }
 0x59d   :  { %v677_v16 = vpop.f32.mrf.mxu0  ;;  %v718_v17 = vpop.f32.mrf.mxu1 }
 0x59e   :  { %v678_v18 = vadd.f32 %v677_v16, %v463_v10  ;;  %v719_v19 = vadd.f32 %v718_v17, %v471_v11  ;;  %v503_v10 = vrot.slane %v454_v53, %v2033_v37  ;;  %v442_v11 = vld [vmem:[#allocation5 + $0x130] sm:$0x11]  ;;  %v443_v16 = vld [vmem:[#allocation5 + $0x138] sm:$0x11] }
 0x59f   :  { %v679_v22 = vpop.f32.mrf.mxu0  ;;  %v720_v23 = vpop.f32.mrf.mxu1 }
 0x5a0   :  { %v2098_v26 = vpack.c.bf16 %v678_v18, %v678_v18  ;;  %v2100_v27 = vpack.c.bf16 %v719_v19, %v719_v19  ;;  %v680_v28 = vadd.f32 %v679_v22, %v467_v14  ;;  %v721_v29 = vadd.f32 %v720_v23, %v475_v15 }
 0x5a1   :  { %v681_v31 = vpop.f32.mrf.mxu0  ;;  %v722_v32 = vpop.f32.mrf.mxu1  ;;  %v499_v18 = vrot.slane %v453_v56, %v2033_v37  ;;  %v507_v19 = vrot.slane %v455_v57, %v2033_v37  ;;  %v456_v23 = vunpack.c.l.bf16 %v442_v11 }
 0x5a2   :  { %v1003_v33 = vmul.bf16 1060454197, %v2098_v26  ;;  %v2103_v34 = vpack.c.bf16 %v680_v28, %v680_v28  ;;  %v1005_v39 = vmul.bf16 1060454197, %v2100_v27  ;;  %v2108_v40 = vpack.c.bf16 %v721_v29, %v721_v29 }
 0x5a3   :  { %v682_v41 = vpop.f32.mrf.mxu0  ;;  %v723_v42 = vpop.f32.mrf.mxu1  ;;  %v458_v28 = vunpack.c.l.bf16 %v443_v16  ;;  %v457_v32 = vunpack.c.h.bf16 %v442_v11  ;;  %v987_v56 = vmul.bf16 1056980736, %v2098_v26  ;;  %v989_v57 = vmul.bf16 1056980736, %v2100_v27  ;;  %v2153_v27 = vld [vmem:[#allocation5 + $0xa8] sm:$0xff] }
 0x5a4   :  { %1874 = verf.bf16 %v1003_v33  ;;  %v1004_v44 = vmul.bf16 1060454197, %v2103_v34  ;;  %v1006_v47 = vmul.bf16 1060454197, %v2108_v40  ;;  %v459_v33 = vunpack.c.h.bf16 %v443_v16 }
 0x5a5   :  { %1876 = verf.bf16 %v1005_v39  ;;  %v759_v48 = vpop.f32.mrf.mxu0  ;;  %v800_v49 = vpop.f32.mrf.mxu1  ;;  %v515_v53 = vrot.slane %v457_v32, %v2033_v37  ;;  %v990_v16 = vmul.bf16 1056980736, %v2108_v40 }
 0x5a6   :  { %1878 = verf.bf16 %v1004_v44  ;;  %v760_v51 = vadd.f32 %v759_v48, %v479_v35  ;;  %v801_v52 = vadd.f32 %v800_v49, %v487_v36 }
 0x5a7   :  { %1880 = verf.bf16 %v1006_v47  ;;  %v761_v54 = vpop.f32.mrf.mxu0  ;;  %v802_v55 = vpop.f32.mrf.mxu1  ;;  %v519_v47 = vrot.slane %v458_v28, %v2033_v37 }
 0x5a8   :  { %v2114_v58 = vpack.c.bf16 %v760_v51, %v760_v51  ;;  %v2116_v62 = vpack.c.bf16 %v801_v52, %v801_v52  ;;  %v762_v3 = vadd.f32 %v761_v54, %v483_v45  ;;  %v803_v4 = vadd.f32 %v802_v55, %v491_v46 }
 0x5a9   :  { %v763_v5 = vpop.f32.mrf.mxu0  ;;  %v804_v6 = vpop.f32.mrf.mxu1  ;;  %v511_v46 = vrot.slane %v456_v23, %v2033_v37  ;;  %v523_v54 = vrot.slane %v459_v33, %v2033_v37 }
 0x5aa   :  { %v1007_v7 = vmul.bf16 1060454197, %v2114_v58  ;;  %v2119_v8 = vpack.c.bf16 %v762_v3, %v762_v3  ;;  %v1009_v12 = vmul.bf16 1060454197, %v2116_v62  ;;  %v2124_v13 = vpack.c.bf16 %v803_v4, %v803_v4  ;;  %v2147_v4 = vld [vmem:[#allocation5 + $0xe0] sm:$0x11] }
 0x5ab   :  { %v764_v14 = vpop.f32.mrf.mxu0  ;;  %v805_v15 = vpop.f32.mrf.mxu1 }
 0x5ac   :  { %1882 = verf.bf16 %v1007_v7  ;;  %v1008_v17 = vmul.bf16 1060454197, %v2119_v8  ;;  %v1010_v20 = vmul.bf16 1060454197, %v2124_v13  ;;  %v988_v7 = vmul.bf16 1056980736, %v2103_v34 }
 0x5ad   :  { %1884 = verf.bf16 %v1009_v12  ;;  %v841_v21 = vpop.f32.mrf.mxu0  ;;  %v882_v22 = vpop.f32.mrf.mxu1  ;;  %v2151_v14 = vld [vmem:[#allocation5 + $0xa0] sm:$0xff]  ;;  %v2155_v15 = vld [vmem:[#allocation5 + $0xe8] sm:$0x11] }
 0x5ae   :  { %1886 = verf.bf16 %v1008_v17  ;;  %v842_v24 = vadd.f32 %v841_v21, %v495_v9  ;;  %v883_v25 = vadd.f32 %v882_v22, %v503_v10  ;;  %v1807_v40 = vcombine.high %v2153_v27, %v2155_v15 }
 0x5af   :  { %1888 = verf.bf16 %v1010_v20  ;;  %v843_v29 = vpop.f32.mrf.mxu0  ;;  %v884_v31 = vpop.f32.mrf.mxu1  ;;  %v1804_v60 = vcombine.low %v2151_v14, %v2147_v4  ;;  %v1806_v61 = vcombine.low %v2153_v27, %v2155_v15 }
 0x5b0   :  { %v2130_v35 = vpack.c.bf16 %v842_v24, %v842_v24  ;;  %v2132_v36 = vpack.c.bf16 %v883_v25, %v883_v25  ;;  %v844_v38 = vadd.f32 %v843_v29, %v499_v18  ;;  %v885_v39 = vadd.f32 %v884_v31, %v507_v19 }
 0x5b1   :  { %v845_v41 = vpop.f32.mrf.mxu0  ;;  %v886_v42 = vpop.f32.mrf.mxu1  ;;  %v1805_v31 = vcombine.high %v2151_v14, %v2147_v4 }
 0x5b2   :  { %v1875_v43 = vpop.eup %1874  ;;  %v1011_v44 = vmul.bf16 1060454197, %v2130_v35  ;;  %v2135_v45 = vpack.c.bf16 %v844_v38, %v844_v38  ;;  %v1013_v49 = vmul.bf16 1060454197, %v2132_v36  ;;  %v2140_v50 = vpack.c.bf16 %v885_v39, %v885_v39 }
 0x5b3   :  { %v1877_v48 = vpop.eup %1876  ;;  %v846_v51 = vpop.f32.mrf.mxu0  ;;  %v1035_v6 = vadd.bf16 1065369472, %v1875_v43 }
 0x5b4   :  { %v887_v52 = vpop.f32.mrf.mxu1  ;;  %v1879_v55 = vpop.eup %1878  ;;  %1890 = verf.bf16 %v1011_v44  ;;  %v1012_v3 = vmul.bf16 1060454197, %v2135_v45  ;;  %v1014_v9 = vmul.bf16 1060454197, %v2140_v50  ;;  %v1037_v37 = vadd.bf16 1065369472, %v1877_v48 }
 0x5b5   :  { %v1881_v5 = vpop.eup %1880  ;;  %1892 = verf.bf16 %v1013_v49  ;;  %v923_v10 = vpop.f32.mrf.mxu0  ;;  %v1036_v18 = vadd.bf16 1065369472, %v1879_v55  ;;  %v1051_v33 = vmul.bf16 %v1035_v6, %v987_v56  ;;  %v992_v49 = vmul.bf16 1056980736, %v2119_v8  ;;  %v2174_v52 = vld [vmem:[#allocation5 + $0xb0] sm:$0xff]  ;;  %v1074_v6 = vld [vmem:[#allocation5 + $0xb8] sm:$0xff] }
 0x5b6   :  { %v964_v11 = vpop.f32.mrf.mxu1  ;;  %1894 = verf.bf16 %v1012_v3  ;;  %v924_v12 = vadd.f32 %v923_v10, %v511_v46  ;;  %v1038_v19 = vadd.bf16 1065369472, %v1881_v5  ;;  %v1053_v38 = vmul.bf16 %v1037_v37, %v989_v57 }
 0x5b7   :  { %v965_v26 = vadd.f32 %v964_v11, %v519_v47  ;;  %1896 = verf.bf16 %v1014_v9  ;;  %v925_v17 = vpop.f32.mrf.mxu0  ;;  %v1052_v28 = vmul.bf16 %v1036_v18, %v988_v7  ;;  %v994_v56 = vmul.bf16 1056980736, %v2124_v13  ;;  %v1082_v13 = vld [vmem:[#allocation5 + $0xf8] sm:$0x11] }
 0x5b8   :  { %v966_v34 = vpop.f32.mrf.mxu1  ;;  %v2158_v20 = vpack.c.bf16 %v924_v12, %v924_v12  ;;  %v926_v22 = vadd.f32 %v925_v17, %v515_v53  ;;  %v1054_v29 = vmul.bf16 %v1038_v19, %v990_v16  ;;  %v2176_v53 = vld [vmem:[#allocation5 + $0xf0] sm:$0x11]  ;;  %v991_v7 = vmul.bf16 1056980736, %v2114_v58 }
 0x5b9   :  { %v2160_v21 = vpack.c.bf16 %v965_v26, %v965_v26  ;;  %v967_v23 = vadd.f32 %v966_v34, %v523_v54  ;;  %v927_v24 = vpop.f32.mrf.mxu0  ;;  %1196 = vmatprep.mubr.bf16.mxu0 %v1052_v28  ;;  %v993_v9 = vmul.bf16 1056980736, %v2116_v62  ;;  %v1809_v63 = vcombine.high %v2174_v52, %v2176_v53 }
 0x5ba   :  { %v968_v25 = vpop.f32.mrf.mxu1  ;;  %v1883_v32 = vpop.eup %1882  ;;  %v1015_v39 = vmul.bf16 1060454197, %v2158_v20  ;;  %v2167_v41 = vpack.c.bf16 %v926_v22, %v926_v22  ;;  %1236 = vmatprep.mubr.bf16.mxu1 %v1054_v29  ;;  %1197 = vmatmul.mubr.bf16.vlgmr.msra.gmra.mxu0 %v1051_v33  ;;  %v1811_v37 = vcombine.high %v1074_v6, %v1082_v13  ;;  %v996_v26 = vmul.bf16 1056980736, %v2135_v45 }
 0x5bb   :  { %v1885_v42 = vpop.eup %1884  ;;  %v1017_v43 = vmul.bf16 1060454197, %v2160_v21  ;;  %v2170_v44 = vpack.c.bf16 %v967_v23, %v967_v23  ;;  %v928_v46 = vpop.f32.mrf.mxu0  ;;  %1237 = vmatmul.mubr.bf16.vlgmr.msra.gmra.mxu1 %v1053_v38  ;;  %v1039_v55 = vadd.bf16 1065369472, %v1883_v32  ;;  %1259 = vmatpush1.bf16.xpose.msra.mxu0 %v1800_v1  ;;  %v998_v4 = vmul.bf16 1056980736, %v2140_v50 }
 0x5bc   :  { %v969_v47 = vpop.f32.mrf.mxu1  ;;  %v1887_v48 = vpop.eup %1886  ;;  %1898 = verf.bf16 %v1015_v39  ;;  %v1016_v51 = vmul.bf16 1060454197, %v2167_v41  ;;  %1299 = vmatpush1.bf16.xpose.msra.mxu1 %v1802_v2  ;;  %v1041_v8 = vadd.bf16 1065369472, %v1885_v42  ;;  %1338 = vmatprep.subr.bf16.mxu0 %v1805_v31  ;;  %v995_v34 = vmul.bf16 1056980736, %v2130_v35 }
 0x5bd   :  { %v1889_v54 = vpop.eup %1888  ;;  %1900 = verf.bf16 %v1017_v43  ;;  %v1018_v57 = vmul.bf16 1060454197, %v2170_v44  ;;  %v1040_v3 = vadd.bf16 1065369472, %v1887_v48  ;;  %1378 = vmatprep.subr.bf16.mxu1 %v1807_v40  ;;  %v1055_v2 = vmul.bf16 %v1039_v55, %v991_v7 }
 0x5be   :  { %1902 = verf.bf16 %v1016_v51  ;;  %v1042_v5 = vadd.bf16 1065369472, %v1889_v54  ;;  %v1057_v11 = vmul.bf16 %v1041_v8, %v993_v9  ;;  %v997_v18 = vmul.bf16 1056980736, %v2132_v36 }
 0x5bf   :  { %1904 = verf.bf16 %v1018_v57  ;;  %v1056_v10 = vmul.bf16 %v1040_v3, %v992_v49  ;;  %v1808_v45 = vcombine.low %v2174_v52, %v2176_v53  ;;  %v1810_v22 = vcombine.low %v1074_v6, %v1082_v13 }
 0x5c0   :  { %v1058_v59 = vmul.bf16 %v1042_v5, %v994_v56  ;;  %v1000_v31 = vmul.bf16 1056980736, %v2167_v41  ;;  %v1002_v35 = vmul.bf16 1056980736, %v2170_v44  ;;  %v999_v39 = vmul.bf16 1056980736, %v2158_v20 }
 0x5c1   :  { %1276 = vmatprep.mubr.bf16.mxu0 %v1056_v10  ;;  %v1001_v42 = vmul.bf16 1056980736, %v2160_v21  ;;  %v1083_v20 = vld [vmem:[#allocation2 + $0x25] ss:$0 sm:$0xff] }
 0x5c2   :  { %v1891_v1 = vpop.eup %1890  ;;  %1316 = vmatprep.mubr.bf16.mxu1 %v1058_v59  ;;  %1277 = vmatmul.mubr.bf16.vlgmr.msra.gmra.mxu0 %v1055_v2 }
 0x5c3   :  { %v1893_v58 = vpop.eup %1892  ;;  %1317 = vmatmul.mubr.bf16.vlgmr.msra.gmra.mxu1 %v1057_v11  ;;  %1339 = vmatpush1.bf16.xpose.msra.mxu0 %v1804_v60  ;;  %v1043_v27 = vadd.bf16 1065369472, %v1891_v1 }
 0x5c4   :  { %v1895_v12 = vpop.eup %1894  ;;  %1379 = vmatpush1.bf16.xpose.msra.mxu1 %v1806_v61  ;;  %v1045_v15 = vadd.bf16 1065369472, %v1893_v58  ;;  %1418 = vmatprep.subr.bf16.mxu0 %v1809_v63 }
 0x5c5   :  { %v1897_v62 = vpop.eup %1896  ;;  %v1044_v14 = vadd.bf16 1065369472, %v1895_v12  ;;  %1458 = vmatprep.subr.bf16.mxu1 %v1811_v37  ;;  %v1059_v23 = vmul.bf16 %v1043_v27, %v995_v34 }
 0x5c6   :  { %v1046_v16 = vadd.bf16 1065369472, %v1897_v62  ;;  %v1061_v24 = vmul.bf16 %v1045_v15, %v997_v18 }
 0x5c7   :  { %v1060_v17 = vmul.bf16 %v1044_v14, %v996_v26 }
 0x5c8   :  { %v1062_v19 = vmul.bf16 %v1046_v16, %v998_v4 }
 0x5c9   :  { %1356 = vmatprep.mubr.bf16.mxu0 %v1060_v17 }
 0x5ca   :  { %v1899_v50 = vpop.eup %1898  ;;  %1396 = vmatprep.mubr.bf16.mxu1 %v1062_v19  ;;  %1357 = vmatmul.mubr.bf16.vlgmr.msra.gmra.mxu0 %v1059_v23 }
 0x5cb   :  { %v1901_v25 = vpop.eup %1900  ;;  %1397 = vmatmul.mubr.bf16.vlgmr.msra.gmra.mxu1 %v1061_v24  ;;  %1419 = vmatpush1.bf16.xpose.msra.mxu0 %v1808_v45  ;;  %v1047_v40 = vadd.bf16 1065369472, %v1899_v50 }
 0x5cc   :  { %v1903_v28 = vpop.eup %1902  ;;  %1459 = vmatpush1.bf16.xpose.msra.mxu1 %v1810_v22  ;;  %v1049_v32 = vadd.bf16 1065369472, %v1901_v25  ;;  %1839 = vmatprep.subr.mxu0 %v1980_v0 }
 0x5cd   :  { %v1905_v29 = vpop.eup %1904  ;;  %v1048_v36 = vadd.bf16 1065369472, %v1903_v28  ;;  %1846 = vmatprep.subr.mxu1 %v1980_v0  ;;  %v1063_v41 = vmul.bf16 %v1047_v40, %v999_v39  ;;  %v1503_v28 = vld [vmem:[#allocation2 + $0x60] sm:$0x1] }
 0x5ce   :  { %v1050_v33 = vadd.bf16 1065369472, %v1905_v29  ;;  %v1065_v46 = vmul.bf16 %v1049_v32, %v1001_v42  ;;  %v1502_v29 = vld [vmem:[#allocation2 + $0x40] sm:$0xff] }
 0x5cf   :  { %v1064_v38 = vmul.bf16 %v1048_v36, %v1000_v31  ;;  %v1485_v32 = vld [vmem:[#allocation2 + $0x26] ss:$0 sm:$0xff] }
 0x5d0   :  { %v1066_v43 = vmul.bf16 %v1050_v33, %v1002_v35 }
 0x5d1   :  { %1436 = vmatprep.mubr.bf16.mxu0 %v1064_v38  ;;  %v1486_v38 = vld [vmem:[#allocation2 + $0x27] ss:$0 sm:$0xff] }
 0x5d2   :  { %1476 = vmatprep.mubr.bf16.mxu1 %v1066_v43  ;;  %1437 = vmatmul.mubr.bf16.vlgmr.msra.gmra.mxu0 %v1063_v41  ;;  %v1504_v43 = vld [vmem:[#allocation2 + $0x61] ss:$0 sm:$0xff] }
 0x5d3   :  { %1477 = vmatmul.mubr.bf16.vlgmr.msra.gmra.mxu1 %v1065_v46  ;;  %1843 = vmatprep.mubr.msk.f32.mxu0 %vm1981_vm2, %v1980_v0 }
 0x5d4   :  { %1848 = vmatprep.mubr.msk.f32.mxu1 %vm1981_vm2, %v1980_v0  ;;  %1840 = vmatpush3.msk.msra.mxu0 %vm83_vm0, %v1503_v28 }
 0x5d5   :  { %1841 = vmatprep.subr.mxu0 %v1980_v0 }
 0x5d6   :  { %1842 = vmatpush3.msra.mxu0 %v1502_v29 }
 0x5d7   :  { %1851 = vmatprep.subr.mxu0 %v1980_v0 }
 0x67a   :  { %v1198_v44 = vpop.f32.mrf.mxu0 }
 0x67b   :  { %v1238_v47 = vpop.f32.mrf.mxu1  ;;  %v1199_v54 = vadd.f32 %v1198_v44, %v1083_v20 }
 0x67c   :  { %v1200_v48 = vpop.f32.mrf.mxu0 }
 0x67d   :  { %v1240_v49 = vpop.f32.mrf.mxu1  ;;  %v1239_v3 = vadd.f32 %v1238_v47, %v1199_v54  ;;  %v1663_v48 = vld [vmem:[#allocation2 + $0x86] ss:$0 sm:$0xff] }
 0x67e   :  { %v1201_v51 = vpop.f32.mrf.mxu0  ;;  %v1583_v49 = vld [vmem:[#allocation2 + $0x84] ss:$0 sm:$0xff] }
 0x67f   :  { %v1241_v21 = vpop.f32.mrf.mxu1 }
 0x680   :  { %v1202_v52 = vpop.f32.mrf.mxu0 }
 0x681   :  { %v1242_v53 = vpop.f32.mrf.mxu1 }
 0x682   :  { %v1278_v55 = vpop.f32.mrf.mxu0  ;;  %v1662_v53 = vld [vmem:[#allocation2 + $0x85] ss:$0 sm:$0xff] }
 0x683   :  { %v1318_v56 = vpop.f32.mrf.mxu1  ;;  %v1279_v13 = vadd.f32 %v1278_v55, %v1239_v3 }
 0x684   :  { %v1280_v57 = vpop.f32.mrf.mxu0 }
 0x685   :  { %v1320_v8 = vpop.f32.mrf.mxu1  ;;  %v1319_v60 = vadd.f32 %v1318_v56, %v1279_v13 }
 0x686   :  { %v1281_v5 = vpop.f32.mrf.mxu0 }
 0x687   :  { %v1321_v6 = vpop.f32.mrf.mxu1 }
 0x688   :  { %v1282_v7 = vpop.f32.mrf.mxu0 }
 0x689   :  { %v1322_v9 = vpop.f32.mrf.mxu1 }
 0x68a   :  { %v1358_v10 = vpop.f32.mrf.mxu0 }
 0x68b   :  { %v1398_v59 = vpop.f32.mrf.mxu1  ;;  %v1359_v1 = vadd.f32 %v1358_v10, %v1319_v60 }
 0x68c   :  { %v1360_v61 = vpop.f32.mrf.mxu0 }
 0x68d   :  { %v1400_v63 = vpop.f32.mrf.mxu1  ;;  %v1399_v12 = vadd.f32 %v1398_v59, %v1359_v1 }
 0x68e   :  { %v1361_v2 = vpop.f32.mrf.mxu0 }
 0x68f   :  { %v1401_v11 = vpop.f32.mrf.mxu1 }
 0x690   :  { %v1362_v37 = vpop.f32.mrf.mxu0 }
 0x691   :  { %v1402_v58 = vpop.f32.mrf.mxu1 }
 0x692   :  { %v1438_v62 = vpop.f32.mrf.mxu0 }
 0x693   :  { %v1478_v26 = vpop.f32.mrf.mxu1  ;;  %v1439_v4 = vadd.f32 %v1438_v62, %v1399_v12 }
 0x694   :  { %v1440_v14 = vpop.f32.mrf.mxu0 }
 0x695   :  { %v1480_v27 = vpop.f32.mrf.mxu1  ;;  %v1479_v15 = vadd.f32 %v1478_v26, %v1439_v4 }
 0x696   :  { %v1441_v16 = vpop.f32.mrf.mxu0 }
 0x697   :  { %v1481_v17 = vpop.f32.mrf.mxu1  ;;  %v1484_v34 = vadd.f32 %v1479_v15, %v2052_v30  ;;  %v1582_v30 = vld [vmem:[#allocation2 + $0x80] sm:$0xf] }
 0x698   :  { %v1442_v18 = vpop.f32.mrf.mxu0  ;;  %1847 = vmatpush3.msk.msra.mxu1 %vm591_vm4, %v1582_v30 }
 0x699   :  { %v1482_v19 = vpop.f32.mrf.mxu1  ;;  %v1487_v45 = vsel %vm79_vm1, %v1484_v34, 0.0 }
 0x69a   :  { %1488 = vadd.xlane.f32.xlu0 %v1487_v45 }
 0x6b0   :  { %1666 = vperm.xlu0 %1867, %v1663_v48  }
 0x723   :  { %v1489_v22 = vpop.xlane.xlu0 %1488 }
 0x724   :  { %v1490_v50 = vmul.f32 0.11111111, %v1489_v22 }
 0x726   :  { %v1491_v23 = vsub.f32 %v1484_v34, %v1490_v50 }
 0x728   :  { %v1492_v24 = vmul.f32 %v1491_v23, %v1491_v23 }
 0x72a   :  { %v1493_v25 = vsel %vm79_vm1, %v1492_v24, 0.0 }
 0x72b   :  { %1494 = vadd.xlane.f32.xlu1 %v1493_v25  ;;  %v1667_v54 = vpop.permute.xlu0 %1666 }
 0x7b4   :  { %v1495_v31 = vpop.xlane.xlu1 %1494 }
 0x7b5   :  { %v1496_v35 = vmul.f32 0.11111111, %v1495_v31 }
 0x7b7   :  { %v1497_v36 = vadd.f32 1e-05, %v1496_v35 }
 0x7b9   :  { %1906 = vrsqrt.f32 %v1497_v36 }
 0x7c6   :  { %v1907_v40 = vpop.eup %1906 }
 0x7c7   :  { %v1499_v33 = vmul.f32 %v1907_v40, %v1491_v23 }
 0x7c9   :  { %v1500_v39 = vmul.f32 %v1499_v33, %v1485_v32 }
 0x7cb   :  { %v1501_v42 = vadd.f32 %v1500_v39, %v1486_v38 }
 0x7cd   :  { %1844 = vmatmul.mubr.msk.f32.vlgmr.msra.gmra.mxu0 %vm79_vm1, %v1501_v42 }
 0x7ce   :  { %1853 = vmatprep.mubr.msk.f32.mxu0 %vm1981_vm2, %v1980_v0 }
 0x88d   :  { %v1577_v41 = vpop.f32.mrf.mxu0 }
 0x88e   :  { %v1578_v46 = vadd.f32 %v1577_v41, %v1504_v43 }
 0x88f   :  { %v1845_v44 = vpop.f32.mrf.mxu0 }
 0x890   :  { %v1581_v47 = vmax.f32 %v1578_v46, 0.0 }
 0x892   :  { %1849 = vmatmul.mubr.msk.f32.vlgmr.msra.gmra.mxu1 %vm1584_vm6, %v1581_v47 }
 0x952   :  { %v1657_v20 = vpop.f32.mrf.mxu1 }
 0x953   :  { %v1658_v51 = vadd.f32 %v1657_v20, %v1583_v49 }
 0x954   :  { %v1850_v21 = vpop.f32.mrf.mxu1 }
 0x955   :  { %v1661_v52 = vmax.f32 %v1658_v51, 0.0 }
 0x957   :  { %1852 = vmatpush3.xpose.msk.msra.mxu0 %vm1584_vm6, %v1661_v52 }
 0x95a   :  { %1854 = vmatmul.mubr.msk.f32.vlgmr.msra.gmra.mxu0 %vm1584_vm6, %v1662_v53 }
 0xa1a   :  { %v1741_v0 = vpop.f32.mrf.mxu0 }
 0xa1b   :  { %v1742_v55 = vadd.f32 %v1741_v0, %v1667_v54 }
 0xa1c   :  { %v1855_v56 = vpop.f32.mrf.mxu0 }
 0xa1d   :  { %1746 = vst.msk [vmem:[#allocation7] sm:$0x1] %vm1745_vm7, %v1742_v55 }
 0xa1e   :  { %1959 = shalt.err (!%p1956_p0)
}
 0xa1f   :  { %1756 = dma.vmem_to_hbm [thread:$0]  %s1754_s26, 16, %s2226_s3, [#allocation4]  }
 0xa20   :  { %1972 = dma.done.wait [#allocation4], 16  }
 0xa21   :  { %1973 = vsyncadd [#allocation4], 4294967280 }
 0xa22   :  { %1760 = vsyncpa [#allocation3], 1 }
 0xa23   :  { %1761 = vsyncpa [#allocation6], 1 }
 0xa24   :  { %1762 = vsyncpa [#allocation4], 1 }

</bundles_post_ra>
